<compile_context>
chip_gen: v7x
topology: tpu7x:2x2x1
jax: 0.10.0
libtpu: 0.0.40
codegen_flags: <defaults>
</compile_context>

<pallas_src>
import functools

import jax
import jax.numpy as jnp
from jax.experimental import pallas as pl
from jax.experimental.pallas import tpu as pltpu


def _partial_sums_kernel(x_ref, t_ref, bce_out, t_out, *,
                         rows, tm, lanes, bps, need_mask, binary_targets):
    # x_ref, t_ref   : (tm, lanes) VMEM blocks of the flattened inputs.
    # bce_out, t_out : (8, lanes) f32 output blocks, resident across the inner
    #                  (reduction) grid axis — one accumulator per core split.
    c = pl.program_id(0)   # core split ("parallel")
    i = pl.program_id(1)   # row-block within the split ("arbitrary")

    @pl.when(i == 0)
    def _init():
        bce_out[...] = jnp.zeros_like(bce_out)
        t_out[...] = jnp.zeros_like(t_out)

    x = x_ref[...].astype(jnp.float32)
    t = t_ref[...].astype(jnp.float32)

    if need_mask:
        # Rows past the true row count come from clipped / duplicated DMAs and
        # must contribute exactly zero.  Mask BEFORE the logs: with x=0, t=0
        # both BCE terms are exactly 0 (t*(-100) = 0 and (1-t)*log(1) = 0).
        blk = c * bps + i
        row_ids = blk * tm + jax.lax.broadcasted_iota(jnp.int32, (tm, lanes), 0)
        valid = row_ids < rows
        x = jnp.where(valid, x, 0.0)
        t = jnp.where(valid, t, 0.0)

    if binary_targets:
        # Exact when target is {0,1}: one EUP log per element instead of two.
        x_eff = jnp.where(t > 0.5, x, 1.0 - x)
        bce = -jnp.maximum(jnp.log(x_eff), -100.0)
    else:
        # Elementwise binary_cross_entropy with PyTorch's log clamp at -100.
        log_x = jnp.maximum(jnp.log(x), -100.0)
        log_1mx = jnp.maximum(jnp.log(1.0 - x), -100.0)
        bce = -(t * log_x + (1.0 - t) * log_1mx)

    # Sublane-group reduction: pure vreg-wise VALU adds into the resident
    # (8, lanes) accumulators; the cross-sublane / cross-lane collapse is
    # deferred to a tiny XLA epilogue in the wrapper.
    bce_out[...] += jnp.sum(bce.reshape(tm // 8, 8, lanes), axis=0)
    t_out[...] += jnp.sum(t.reshape(tm // 8, 8, lanes), axis=0)


def _sublane_multiple(dtype):
    itemsize = jnp.dtype(dtype).itemsize
    return {1: 32, 2: 16}.get(itemsize, 8)


def b_focal_loss(x, target, gamma=2, alpha=0.25, reduction="mean", *,
                 binary_targets=False, core_splits=2,
                 block_bytes=2 * 1024 * 1024, max_rows=1024, lanes=None):
    """Pallas implementation of B_FocalLoss.forward ('mean' / 'sum' / 'none')."""
    n = int(x.size)
    sub = max(_sublane_multiple(x.dtype), _sublane_multiple(target.dtype))

    xf = x.reshape(-1)
    tf = target.reshape(-1)

    # Common path: element count is a multiple of 128 -> purely free reshapes.
    n_work = n
    if n_work % 128 != 0 or n_work < sub * 128:
        # TODO(synk): rare ragged/tiny case still pays one zero-pad copy
        # (padding with x=0, t=0 is numerically exact for both sums).
        n_work = max(((n_work + 127) // 128) * 128, sub * 128)
        xf = jnp.pad(xf, (0, n_work - n))
        tf = jnp.pad(tf, (0, n_work - n))

    # Lane width: largest 128-multiple dividing n_work that still leaves at
    # least `sub` rows (so the row-block height can match the dtype tiling).
    if not (lanes is not None and lanes % 128 == 0 and
            n_work % lanes == 0 and n_work // lanes >= sub):
        lanes = 128
        for cand in (2048, 1024, 512, 256, 128):
            if n_work % cand == 0 and n_work // cand >= sub:
                lanes = cand
                break
    rows = n_work // lanes
    x2 = xf.reshape(rows, lanes)
    t2 = tf.reshape(rows, lanes)

    # Row-block height: ~block_bytes per input per pipeline buffer, sublane
    # aligned, never taller than the array.  Partial trailing blocks are
    # clipped by Pallas and the in-kernel row mask zeroes their contribution.
    itemsize = max(jnp.dtype(x.dtype).itemsize, jnp.dtype(target.dtype).itemsize)
    tm = block_bytes // (lanes * itemsize)
    tm = max(sub, min(tm, max_rows, (rows // sub) * sub))
    tm = (tm // sub) * sub

    blocks_total = -(-rows // tm)
    num_splits = max(1, min(int(core_splits), blocks_total))
    bps = -(-blocks_total // num_splits)          # blocks per split
    need_mask = (num_splits * bps * tm != rows)

    if num_splits * bps > blocks_total:
        # Some (split, step) pairs would start past the last block; clamp the
        # DMA to the last valid block (its contribution is masked to zero).
        def in_map(c, i):
            return (jnp.minimum(c * bps + i, blocks_total - 1), 0)
    else:
        def in_map(c, i):
            return (c * bps + i, 0)

    kernel = functools.partial(
        _partial_sums_kernel, rows=rows, tm=tm, lanes=lanes, bps=bps,
        need_mask=need_mask, binary_targets=bool(binary_targets))

    # VMEM budget: 2 inputs x 2 buffers x <=2 MiB + 2 x (8*lanes*4B) outputs
    # stays well under the default scoped-VMEM limit on v5e/v6e/v7x.
    bce_part, t_part = pl.pallas_call(
        kernel,
        out_shape=(jax.ShapeDtypeStruct((num_splits, 8, lanes), jnp.float32),
                   jax.ShapeDtypeStruct((num_splits, 8, lanes), jnp.float32)),
        grid=(num_splits, bps),
        in_specs=[pl.BlockSpec((tm, lanes), in_map),
                  pl.BlockSpec((tm, lanes), in_map)],
        out_specs=(pl.BlockSpec((None, 8, lanes), lambda c, i: (c, 0, 0)),
                   pl.BlockSpec((None, 8, lanes), lambda c, i: (c, 0, 0))),
        compiler_params=pltpu.CompilerParams(
            dimension_semantics=("parallel", "arbitrary")),
    )(x2, t2)

    # Tiny scalar epilogue: combine per-core partials, then exp/pow/scale.
    bce_sum = jnp.sum(bce_part)
    t_sum = jnp.sum(t_part)
    inv_n = 1.0 / float(n)
    logp = bce_sum * inv_n                       # mean BCE over the TRUE count
    p = jnp.exp(-logp)
    scale = alpha * (1.0 - p) ** gamma * logp
    if reduction == "mean":
        return scale * t_sum * inv_n
    if reduction == "sum":
        return scale * t_sum
    # reduction == 'none' (or anything else, matching the PyTorch module):
    # elementwise loss tensor = scalar scale broadcast over target.
    return scale * target.astype(jnp.float32)


def b_focal_loss_reference(x, target, gamma=2, alpha=0.25, reduction="mean"):
    """Pure-JAX reference matching the PyTorch B_FocalLoss forward."""
    log_x = jnp.maximum(jnp.log(x), -100.0)
    log_1mx = jnp.maximum(jnp.log(1.0 - x), -100.0)
    logp = jnp.mean(-(target * log_x + (1.0 - target) * log_1mx))
    p = jnp.exp(-logp)
    loss = alpha * (1.0 - p) ** gamma * logp * target
    if reduction == "mean":
        return jnp.mean(loss)
    if reduction == "sum":
        return jnp.sum(loss)
    return loss


if __name__ == "__main__":
    N, C, H, W = 2, 4, 16, 16
    key = jax.random.PRNGKey(0)
    kx, kt = jax.random.split(key)
    # input must be probabilities in (0,1); target is binary.
    x = jax.nn.sigmoid(jax.random.normal(kx, (N, C, H, W), dtype=jnp.float32))
    t = (jax.random.uniform(kt, (N, C, H, W)) > 0.5).astype(jnp.float32)

    ref = jax.block_until_ready(b_focal_loss_reference(x, t))

    # Default path.
    out = jax.block_until_ready(b_focal_loss(x, t))
    assert out.shape == ()
    assert jnp.allclose(out, ref, atol=1e-5, rtol=1e-4), (out, ref)

    # Single-log fast path (exact for {0,1} targets).
    out_fast = jax.block_until_ready(b_focal_loss(x, t, binary_targets=True))
    assert jnp.allclose(out_fast, ref, atol=1e-5, rtol=1e-4), (out_fast, ref)

    # 'sum' reduction.
    out_sum = jax.block_until_ready(b_focal_loss(x, t, reduction="sum"))
    ref_sum = b_focal_loss_reference(x, t, reduction="sum")
    assert jnp.allclose(out_sum, ref_sum, atol=1e-4, rtol=1e-4), (out_sum, ref_sum)

    # 'none' reduction (elementwise loss tensor).
    out_none = jax.block_until_ready(b_focal_loss(x, t, reduction="none"))
    ref_none = b_focal_loss_reference(x, t, reduction="none")
    assert out_none.shape == (N, C, H, W)
    assert jnp.allclose(out_none, ref_none, atol=1e-5, rtol=1e-4)

    # bf16 inputs stream at half the HBM bytes; compute stays f32 in-kernel.
    xb = x.astype(jnp.bfloat16)
    tb = t.astype(jnp.bfloat16)
    ref_b = b_focal_loss_reference(xb.astype(jnp.float32), tb.astype(jnp.float32))
    out_b = jax.block_until_ready(b_focal_loss(xb, tb))
    assert jnp.allclose(out_b, ref_b, atol=1e-3, rtol=1e-3), (out_b, ref_b)

    # Exercise the dual-split (leading parallel axis) accumulation path.
    out_split = jax.block_until_ready(
        b_focal_loss(x, t, lanes=128, block_bytes=8 * 128 * 4))
    assert jnp.allclose(out_split, ref, atol=1e-5, rtol=1e-4), (out_split, ref)

    # Exercise the partial-trailing-block + in-kernel row-mask path
    # (15 rows of 256 lanes -> two blocks, last one clipped and masked).
    x3 = jax.nn.sigmoid(jax.random.normal(kx, (3, 5, 16, 16), dtype=jnp.float32))
    t3 = (jax.random.uniform(kt, (3, 5, 16, 16)) > 0.5).astype(jnp.float32)
    ref3 = jax.block_until_ready(b_focal_loss_reference(x3, t3))
    out3 = jax.block_until_ready(b_focal_loss(x3, t3))
    assert jnp.allclose(out3, ref3, atol=1e-5, rtol=1e-4), (out3, ref3)
    out3_fast = jax.block_until_ready(b_focal_loss(x3, t3, binary_targets=True))
    assert jnp.allclose(out3_fast, ref3, atol=1e-5, rtol=1e-4), (out3_fast, ref3)

    print("KERNEL_OK")
</pallas_src>

<mosaic_0001>
module attributes {stable_mosaic.version = 11 : i64} {
  func.func @_partial_sums_kernel(%arg0: i32, %arg1: i32, %arg2: memref<8x256xf32, #tpu.memory_space<vmem>>, %arg3: memref<8x256xf32, #tpu.memory_space<vmem>>, %arg4: memref<1x8x256xf32, #tpu.memory_space<vmem>>, %arg5: memref<1x8x256xf32, #tpu.memory_space<vmem>>) attributes {dimension_semantics = [#tpu.dimension_semantics<parallel>, #tpu.dimension_semantics<arbitrary>], iteration_bounds = array<i64: 1, 1>, scalar_prefetch = 0 : i64, scratch_operands = 0 : i64, tpu.core_type = #tpu.core_type<tc>, window_params = [{transform_indices = @transform_0, window_bounds = array<i64: 8, 256>}, {transform_indices = @transform_1, window_bounds = array<i64: 8, 256>}, {transform_indices = @transform_2, window_bounds = array<i64: 1, 8, 256>}, {transform_indices = @transform_3, window_bounds = array<i64: 1, 8, 256>}]} {
    %c0_i32 = arith.constant 0 : i32
    %0 = arith.cmpi eq, %arg1, %c0_i32 : i32
    %1 = arith.extui %0 : i1 to i32
    %c0_i32_0 = arith.constant 0 : i32
    %2 = arith.cmpi ne, %1, %c0_i32_0 : i32
    scf.if %2 {
      %cst_22 = arith.constant 0.000000e+00 : f32
      %36 = vector.broadcast %cst_22 : f32 to vector<8x256xf32>
      %c0_23 = arith.constant 0 : index
      %c0_24 = arith.constant 0 : index
      %c0_25 = arith.constant 0 : index
      %37 = vector.load %arg4[%c0_23, %c0_24, %c0_25] : memref<1x8x256xf32, #tpu.memory_space<vmem>>, vector<1x8x256xf32>
      %38 = vector.shape_cast %37 : vector<1x8x256xf32> to vector<8x256xf32>
      %39 = vector.shape_cast %36 : vector<8x256xf32> to vector<1x8x256xf32>
      tpu.vector_store %arg4[%c0_23, %c0_24, %c0_25], %39 {strides = array<i32>} : memref<1x8x256xf32, #tpu.memory_space<vmem>>, vector<1x8x256xf32>,
      %cst_26 = arith.constant 0.000000e+00 : f32
      %40 = vector.broadcast %cst_26 : f32 to vector<8x256xf32>
      %c0_27 = arith.constant 0 : index
      %c0_28 = arith.constant 0 : index
      %c0_29 = arith.constant 0 : index
      %41 = vector.load %arg5[%c0_27, %c0_28, %c0_29] : memref<1x8x256xf32, #tpu.memory_space<vmem>>, vector<1x8x256xf32>
      %42 = vector.shape_cast %41 : vector<1x8x256xf32> to vector<8x256xf32>
      %43 = vector.shape_cast %40 : vector<8x256xf32> to vector<1x8x256xf32>
      tpu.vector_store %arg5[%c0_27, %c0_28, %c0_29], %43 {strides = array<i32>} : memref<1x8x256xf32, #tpu.memory_space<vmem>>, vector<1x8x256xf32>,
    } else {
    }
    %c0 = arith.constant 0 : index
    %c0_1 = arith.constant 0 : index
    %3 = vector.load %arg2[%c0, %c0_1] : memref<8x256xf32, #tpu.memory_space<vmem>>, vector<8x256xf32>
    %c0_2 = arith.constant 0 : index
    %c0_3 = arith.constant 0 : index
    %4 = vector.load %arg3[%c0_2, %c0_3] : memref<8x256xf32, #tpu.memory_space<vmem>>, vector<8x256xf32>
    %5 = math.log %3 : vector<8x256xf32>
    %cst = arith.constant -1.000000e+02 : f32
    %6 = vector.broadcast %cst : f32 to vector<8x256xf32>
    %7 = arith.maximumf %5, %6 : vector<8x256xf32>
    %cst_4 = arith.constant 1.000000e+00 : f32
    %8 = vector.broadcast %cst_4 : f32 to vector<8x256xf32>
    %9 = arith.subf %8, %3 : vector<8x256xf32>
    %10 = math.log %9 : vector<8x256xf32>
    %cst_5 = arith.constant -1.000000e+02 : f32
    %11 = vector.broadcast %cst_5 : f32 to vector<8x256xf32>
    %12 = arith.maximumf %10, %11 : vector<8x256xf32>
    %13 = arith.mulf %4, %7 : vector<8x256xf32>
    %cst_6 = arith.constant 1.000000e+00 : f32
    %14 = vector.broadcast %cst_6 : f32 to vector<8x256xf32>
    %15 = arith.subf %14, %4 : vector<8x256xf32>
    %16 = arith.mulf %15, %12 : vector<8x256xf32>
    %17 = arith.addf %13, %16 : vector<8x256xf32>
    %cst_7 = arith.constant 0.000000e+00 : f32
    %18 = vector.broadcast %cst_7 : f32 to vector<8x256xf32>
    %19 = arith.subf %18, %17 : vector<8x256xf32>
    %c0_8 = arith.constant 0 : index
    %c0_9 = arith.constant 0 : index
    %c0_10 = arith.constant 0 : index
    %20 = vector.load %arg4[%c0_8, %c0_9, %c0_10] : memref<1x8x256xf32, #tpu.memory_space<vmem>>, vector<1x8x256xf32>
    %21 = vector.shape_cast %20 : vector<1x8x256xf32> to vector<8x256xf32>
    %22 = vector.shape_cast %19 : vector<8x256xf32> to vector<1x8x256xf32>
    %cst_11 = arith.constant dense<0.000000e+00> : vector<8x256xf32>
    %23 = vector.multi_reduction <add>, %22, %cst_11 [0] : vector<1x8x256xf32> to vector<8x256xf32>
    %24 = arith.addf %21, %23 : vector<8x256xf32>
    %c0_12 = arith.constant 0 : index
    %c0_13 = arith.constant 0 : index
    %c0_14 = arith.constant 0 : index
    %25 = vector.load %arg4[%c0_12, %c0_13, %c0_14] : memref<1x8x256xf32, #tpu.memory_space<vmem>>, vector<1x8x256xf32>
    %26 = vector.shape_cast %25 : vector<1x8x256xf32> to vector<8x256xf32>
    %27 = vector.shape_cast %24 : vector<8x256xf32> to vector<1x8x256xf32>
    tpu.vector_store %arg4[%c0_12, %c0_13, %c0_14], %27 {strides = array<i32>} : memref<1x8x256xf32, #tpu.memory_space<vmem>>, vector<1x8x256xf32>,
    %c0_15 = arith.constant 0 : index
    %c0_16 = arith.constant 0 : index
    %c0_17 = arith.constant 0 : index
    %28 = vector.load %arg5[%c0_15, %c0_16, %c0_17] : memref<1x8x256xf32, #tpu.memory_space<vmem>>, vector<1x8x256xf32>
    %29 = vector.shape_cast %28 : vector<1x8x256xf32> to vector<8x256xf32>
    %30 = vector.shape_cast %4 : vector<8x256xf32> to vector<1x8x256xf32>
    %cst_18 = arith.constant dense<0.000000e+00> : vector<8x256xf32>
    %31 = vector.multi_reduction <add>, %30, %cst_18 [0] : vector<1x8x256xf32> to vector<8x256xf32>
    %32 = arith.addf %29, %31 : vector<8x256xf32>
    %c0_19 = arith.constant 0 : index
    %c0_20 = arith.constant 0 : index
    %c0_21 = arith.constant 0 : index
    %33 = vector.load %arg5[%c0_19, %c0_20, %c0_21] : memref<1x8x256xf32, #tpu.memory_space<vmem>>, vector<1x8x256xf32>
    %34 = vector.shape_cast %33 : vector<1x8x256xf32> to vector<8x256xf32>
    %35 = vector.shape_cast %32 : vector<8x256xf32> to vector<1x8x256xf32>
    tpu.vector_store %arg5[%c0_19, %c0_20, %c0_21], %35 {strides = array<i32>} : memref<1x8x256xf32, #tpu.memory_space<vmem>>, vector<1x8x256xf32>,
    return
  }
  func.func @transform_0(%arg0: i32, %arg1: i32) -> (i32, i32) {
    %c1_i32 = arith.constant 1 : i32
    %0 = arith.muli %arg0, %c1_i32 : i32
    %1 = arith.addi %0, %arg1 : i32
    %c0_i32 = arith.constant 0 : i32
    %c0_i32_0 = arith.constant 0 : i32
    return %1, %c0_i32 : i32, i32
  }
  func.func @transform_1(%arg0: i32, %arg1: i32) -> (i32, i32) {
    %c1_i32 = arith.constant 1 : i32
    %0 = arith.muli %arg0, %c1_i32 : i32
    %1 = arith.addi %0, %arg1 : i32
    %c0_i32 = arith.constant 0 : i32
    %c0_i32_0 = arith.constant 0 : i32
    return %1, %c0_i32 : i32, i32
  }
  func.func @transform_2(%arg0: i32, %arg1: i32) -> (i32, i32, i32) {
    %c0_i32 = arith.constant 0 : i32
    %c0_i32_0 = arith.constant 0 : i32
    %c0_i32_1 = arith.constant 0 : i32
    return %arg0, %c0_i32, %c0_i32_0 : i32, i32, i32
  }
  func.func @transform_3(%arg0: i32, %arg1: i32) -> (i32, i32, i32) {
    %c0_i32 = arith.constant 0 : i32
    %c0_i32_0 = arith.constant 0 : i32
    %c0_i32_1 = arith.constant 0 : i32
    return %arg0, %c0_i32, %c0_i32_0 : i32, i32, i32
  }
}

</mosaic_0001>

<bundles_post_ra>
// kernel: tpu_custom_call.1
= control target key start
LH: loop header
LB: loop body
LE: loop exit
PB: predicated region body
PF: predicated region fallthrough
CT: control target
= control target key end

     0   :  { %9 = vsyncpa [#allocation3], 0  ;;  %s312_s0 = inlined_call_operand.hbm [shape: f32[8,256], index: 0, kind: input, shape index: {}]   ;;  %s313_s1 = inlined_call_operand.hbm [shape: f32[8,256], index: 1, kind: input, shape index: {}]   ;;  %s314_s2 = inlined_call_operand.hbm [shape: f32[1,8,256], index: 2, kind: output, shape index: {0}]   ;;  %s315_s3 = inlined_call_operand.hbm [shape: f32[1,8,256], index: 3, kind: output, shape index: {1}]  }
   0x1   :  { %10 = vsyncpa [#allocation6], 0 }
   0x2   :  { %11 = vsyncpa [#allocation4], 0 }
   0x3   :  { %12 = vsyncpa [#allocation9], 0  ;;  %s240_s12 = smov [#allocation2]   ;;  %s241_s14 = smov [#allocation5]  }
   0x4   :  { %s23_s13 = sshll.u32 %s240_s12, 4  ;;  %s37_s15 = sshll.u32 %s241_s14, 4  ;;  %s24_s13 = int_to_ptr.vmem [resolvable:$true] %s23_s13  ;;  %s38_s15 = int_to_ptr.vmem [resolvable:$true] %s37_s15 }
   0x5   :  { %s144_s18 = scalar_lea.hbm %s312_s0, 256 }
   0x6   :  { %p145_p0 = scmp.ne.s32.totalorder %s312_s0, %s144_s18  ;;  %p148_p1 = scmp.lt.u32.totalorder %s144_s18, %s312_s0 }
   0x8   :  { %p150_p2 = pnand %p148_p1, %p145_p0 }
   0xa   :  { %153 = shalt.err (!%p150_p2)
}
   0xb   :  { %s154_s23 = scalar_lea.vmem %s24_s13, 256  ;;  %p159_p4 = scmp.lt.s32.totalorder %s24_s13, %s24_s13 }
   0xc   :  { %p155_p3 = scmp.ne.s32.totalorder %s24_s13, %s154_s23  ;;  %p160_p5 = scmp.lt.s32.totalorder %s154_s23, %s154_s23 }
   0xe   :  { %p161_p6 = por %p160_p5, %p159_p4 }
  0x10   :  { %p162_p7 = pnand %p161_p6, %p155_p3 }
  0x12   :  { %165 = shalt.err (!%p162_p7)
}
  0x13   :  { %26 = dma.hbm_to_vmem [thread:$0]  %s312_s0, 256, %s24_s13, [#allocation3]  }
  0x14   :  { %s166_s28 = scalar_lea.hbm %s313_s1, 256 }
  0x15   :  { %p167_p8 = scmp.ne.s32.totalorder %s313_s1, %s166_s28  ;;  %p170_p9 = scmp.lt.u32.totalorder %s166_s28, %s313_s1 }
  0x17   :  { %p172_p10 = pnand %p170_p9, %p167_p8 }
  0x19   :  { %175 = shalt.err (!%p172_p10)
}
  0x1a   :  { %s176_s6 = scalar_lea.vmem %s38_s15, 256  ;;  %p181_p12 = scmp.lt.s32.totalorder %s38_s15, %s38_s15 }
  0x1b   :  { %p177_p11 = scmp.ne.s32.totalorder %s38_s15, %s176_s6  ;;  %p182_p13 = scmp.lt.s32.totalorder %s176_s6, %s176_s6 }
  0x1d   :  { %p183_p0 = por %p182_p13, %p181_p12 }
  0x1f   :  { %p184_p1 = pnand %p183_p0, %p177_p11 }
  0x21   :  { %187 = shalt.err (!%p184_p1)
}
  0x22   :  { %40 = dma.hbm_to_vmem [thread:$0]  %s313_s1, 256, %s38_s15, [#allocation6]  }
  0x23   :  { %232 = dma.done.wait [#allocation3], 256  }
  0x24   :  { %233 = vsyncadd [#allocation3], 4294967040 }
  0x25   :  { %234 = dma.done.wait [#allocation6], 256  }
  0x26   :  { %235 = vsyncadd [#allocation6], 4294967040  ;;  %s242_s8 = smov [#allocation8]   ;;  %v57_v0 = vld [vmem:[#allocation2] sm:$0xff]  ;;  %v58_v1 = vld [vmem:[#allocation2 + $0x8] sm:$0xff] }
  0x27   :  { %s117_s9 = sshll.u32 %s242_s8, 4  ;;  %v59_v2 = vld [vmem:[#allocation5] sm:$0xff]  ;;  %136 = vlog2.f32 %v57_v0  ;;  %v67_v3 = vsub.f32 1.0, %v57_v0  ;;  %v60_v4 = vld [vmem:[#allocation5 + $0x8] sm:$0xff]  ;;  %v68_v5 = vsub.f32 1.0, %v58_v1  ;;  %s118_s9 = int_to_ptr.vmem [resolvable:$true] %s117_s9 }
  0x28   :  { %138 = vlog2.f32 %v58_v1  ;;  %99 = vst [vmem:[#allocation8] sm:$0xff] %v59_v2  ;;  %100 = vst [vmem:[#allocation8 + $0x8] sm:$0xff] %v60_v4  ;;  %s188_s1 = scalar_lea.vmem %s118_s9, 256  ;;  %p193_p3 = scmp.lt.s32.totalorder %s118_s9, %s118_s9 }
  0x29   :  { %140 = vlog2.f32 %v67_v3  ;;  %p189_p2 = scmp.ne.s32.totalorder %s118_s9, %s188_s1  ;;  %p194_p4 = scmp.lt.s32.totalorder %s188_s1, %s188_s1 }
  0x2a   :  { %142 = vlog2.f32 %v68_v5 }
  0x2b   :  { %p195_p5 = por %p194_p4, %p193_p3 }
  0x2d   :  { %p196_p6 = pnand %p195_p5, %p189_p2 }
  0x2f   :  { %199 = shalt.err (!%p196_p6)
}
  0x30   :  { %s200_s12 = scalar_lea.hbm %s315_s3, 256 }
  0x31   :  { %p201_p7 = scmp.ne.s32.totalorder %s315_s3, %s200_s12  ;;  %p204_p8 = scmp.lt.u32.totalorder %s200_s12, %s315_s3 }
  0x33   :  { %p206_p9 = pnand %p204_p8, %p201_p7 }
  0x35   :  { %209 = shalt.err (!%p206_p9)
}
  0x36   :  { %120 = dma.vmem_to_hbm [thread:$0]  %s118_s9, 256, %s315_s3, [#allocation9]   ;;  %v137_v6 = vpop.eup %136  ;;  %v77_v14 = vsub.f32 1.0, %v59_v2  ;;  %v78_v17 = vsub.f32 1.0, %v60_v4 }
  0x37   :  { %v139_v7 = vpop.eup %138  ;;  %v62_v8 = vmul.f32 0.6931472, %v137_v6  ;;  %s243_s3 = smov [#allocation7]  }
  0x38   :  { %v141_v9 = vpop.eup %140  ;;  %v64_v10 = vmul.f32 0.6931472, %v139_v7  ;;  %s107_s19 = sshll.u32 %s243_s3, 4  ;;  %s108_s19 = int_to_ptr.vmem [resolvable:$true] %s107_s19 }
  0x39   :  { %v143_v11 = vpop.eup %142  ;;  %v65_v12 = vmax.f32 %v62_v8, -100.0  ;;  %v70_v13 = vmul.f32 0.6931472, %v141_v9  ;;  %s210_s20 = scalar_lea.vmem %s108_s19, 256  ;;  %p215_p11 = scmp.lt.s32.totalorder %s108_s19, %s108_s19 }
  0x3a   :  { %v66_v15 = vmax.f32 %v64_v10, -100.0  ;;  %v72_v16 = vmul.f32 0.6931472, %v143_v11  ;;  %p211_p10 = scmp.ne.s32.totalorder %s108_s19, %s210_s20  ;;  %p216_p12 = scmp.lt.s32.totalorder %s210_s20, %s210_s20 }
  0x3b   :  { %v73_v18 = vmax.f32 %v70_v13, -100.0  ;;  %v75_v19 = vmul.f32 %v65_v12, %v59_v2 }
  0x3c   :  { %v74_v20 = vmax.f32 %v72_v16, -100.0  ;;  %v76_v21 = vmul.f32 %v66_v15, %v60_v4  ;;  %p217_p13 = por %p216_p12, %p215_p11 }
  0x3d   :  { %v79_v22 = vmul.f32 %v77_v14, %v73_v18 }
  0x3e   :  { %v80_v23 = vmul.f32 %v78_v17, %v74_v20  ;;  %p218_p0 = pnand %p217_p13, %p211_p10 }
  0x3f   :  { %v81_v24 = vadd.f32 %v79_v22, %v75_v19 }
  0x40   :  { %v82_v25 = vadd.f32 %v80_v23, %v76_v21 }
  0x41   :  { %v83_v26 = vsub.f32 0.0, %v81_v24 }
  0x42   :  { %v84_v27 = vsub.f32 0.0, %v82_v25 }
  0x43   :  { %91 = vst [vmem:[#allocation7] sm:$0xff] %v83_v26 }
  0x44   :  { %92 = vst [vmem:[#allocation7 + $0x8] sm:$0xff] %v84_v27 }
  0x45   :  { %221 = shalt.err (!%p218_p0)
}
  0x46   :  { %s222_s23 = scalar_lea.hbm %s314_s2, 256 }
  0x47   :  { %p223_p1 = scmp.ne.s32.totalorder %s314_s2, %s222_s23  ;;  %p226_p2 = scmp.lt.u32.totalorder %s222_s23, %s314_s2 }
  0x49   :  { %p228_p3 = pnand %p226_p2, %p223_p1 }
  0x4b   :  { %231 = shalt.err (!%p228_p3)
}
  0x4c   :  { %110 = dma.vmem_to_hbm [thread:$0]  %s108_s19, 256, %s314_s2, [#allocation4]  }
  0x4d   :  { %236 = dma.done.wait [#allocation4], 256  }
  0x4e   :  { %237 = vsyncadd [#allocation4], 4294967040 }
  0x4f   :  { %238 = dma.done.wait [#allocation9], 256  }
  0x50   :  { %239 = vsyncadd [#allocation9], 4294967040 }
  0x51   :  { %127 = vsyncpa [#allocation3], 1 }
  0x52   :  { %128 = vsyncpa [#allocation6], 1 }
  0x53   :  { %129 = vsyncpa [#allocation4], 1 }
  0x54   :  { %130 = vsyncpa [#allocation9], 1 }

</bundles_post_ra>
